<compile_context>
chip_gen: v7x
topology: tpu7x:2x2x1
jax: 0.10.0
libtpu: 0.0.40
codegen_flags: <defaults>
</compile_context>

<pallas_src>
import functools
import math

import jax
import jax.numpy as jnp
from jax import lax
from jax.experimental import pallas as pl
from jax.experimental.pallas import tpu as pltpu


def _round_up(a, b):
    return ((a + b - 1) // b) * b


def _gplvm_cov_tri_kernel(iblk_ref, jblk_ref, params_ref,
                          xr_ref, xc_ref, hr_ref, hc_ref,
                          cov_hbm,
                          tile_buf, mirror_buf, sem,
                          *, steps_per_core, bf16_exp):
    """One upper-triangle (T, T) tile of the scaled-RBF covariance + its mirror.

    iblk_ref/jblk_ref: (2*H,) i32 SMEM  — row/col block index per flattened step
    params_ref:        (2,)   f32 SMEM  — [1/lengthscale^2, log(outputscale)]
    xr_ref:            (T, Q) f32 VMEM  — row block of latents
    xc_ref:            (T, Q) f32 VMEM  — col block of latents
    hr_ref:            (T, 1) f32 VMEM  — 0.5*||x_i||^2/ls^2 for the row block
    hc_ref:            (1, T) f32 VMEM  — 0.5*||x_j||^2/ls^2 for the col block
    cov_hbm:           (Np, Np) HBM ref (memory_space=pl.ANY) — full output
    tile_buf/mirror_buf: (2, T, T) VMEM — double-buffered writeback staging
    sem:               (2, 2) DMA semaphores — [stream (tile/mirror), slot]
    """
    c = pl.program_id(0)            # core split (outer, "parallel")
    h = pl.program_id(1)            # per-core step (inner, "arbitrary")
    nh = pl.num_programs(1)
    tsz = tile_buf.shape[-1]
    slot = h % 2
    s = c * steps_per_core + h      # flattened step -> index tables
    i = iblk_ref[s]
    j = jblk_ref[s]

    def _wait(sl):
        # Wait by size only; the original destination indices are irrelevant.
        pltpu.make_async_copy(tile_buf.at[sl],
                              cov_hbm.at[pl.ds(0, tsz), pl.ds(0, tsz)],
                              sem.at[0, sl]).wait()
        pltpu.make_async_copy(mirror_buf.at[sl],
                              cov_hbm.at[pl.ds(0, tsz), pl.ds(0, tsz)],
                              sem.at[1, sl]).wait()

    # Double-buffered writeback: before overwriting this slot's staging buffers,
    # wait for the DMAs issued two (inner) steps ago on the same slot.
    @pl.when(h >= 2)
    def _():
        _wait(slot)

    inv_ls2 = params_ref[0]
    log_os = params_ref[1]

    # Fold 1/lengthscale^2 into the small (T, Q) operand; K = Q matmul is tiny,
    # the EUP exp below is the binding unit, not the MXU.
    xr = xr_ref[...] * inv_ls2
    sgram = lax.dot_general(
        xr, xc_ref[...],
        dimension_numbers=(((1,), (1,)), ((), ())),
        preferred_element_type=jnp.float32,
    )

    # -0.5*d2/ls^2 = sgram - hsq_i - hsq_j ; clamp <= 0 so the diagonal (and the
    # zero-padded edge rows) never exceed outputscale.
    expo = jnp.minimum(sgram - hr_ref[...] - hc_ref[...], 0.0) + log_os
    if bf16_exp:
        # v6e/v7x bf16 EUP path (~2x transcendental rate); ~1e-2 relative error.
        vals = jnp.exp(expo.astype(jnp.bfloat16)).astype(jnp.float32)
    else:
        vals = jnp.exp(expo)

    tile_buf[slot] = vals.astype(tile_buf.dtype)

    # Mirrored tile.  Diagonal tiles (i == j) target the same HBM region, so use
    # the identical (symmetric) payload to keep the duplicate write deterministic.
    @pl.when(i == j)
    def _():
        mirror_buf[slot] = vals.astype(mirror_buf.dtype)

    @pl.when(i != j)
    def _():
        mirror_buf[slot] = vals.T.astype(mirror_buf.dtype)   # XLU transpose (slack)

    row0 = pl.multiple_of(i * tsz, 128)
    col0 = pl.multiple_of(j * tsz, 128)
    pltpu.make_async_copy(tile_buf.at[slot],
                          cov_hbm.at[pl.ds(row0, tsz), pl.ds(col0, tsz)],
                          sem.at[0, slot]).start()
    pltpu.make_async_copy(mirror_buf.at[slot],
                          cov_hbm.at[pl.ds(col0, tsz), pl.ds(row0, tsz)],
                          sem.at[1, slot]).start()

    # Drain all in-flight writebacks before this core finishes its sequence.
    @pl.when(h == nh - 1)
    def _():
        _wait(slot)
        if steps_per_core >= 2:
            _wait(1 - slot)


def gplvm_forward(x_latent, lengthscale, outputscale, mean_const,
                  *, tile=512, out_dtype=jnp.float32, bf16_exp=None):
    """Pallas-backed GP prior forward: returns (mean (N,), covariance (N, N)).

    tile:      square covariance tile edge (multiple of 128; default 512).
    out_dtype: float32 (default, v5e-safe) or bfloat16 (v6e/v7x: halves the N^2
               writeback and enables the bf16 EUP exp path).
    bf16_exp:  override for the bf16 exp path; defaults to (out_dtype==bfloat16).
    """
    x_latent = jnp.asarray(x_latent, jnp.float32)
    n, q = x_latent.shape
    if bf16_exp is None:
        bf16_exp = jnp.dtype(out_dtype) == jnp.dtype(jnp.bfloat16)

    # Square tile (required so mirrored (j, i) writes land on the same block
    # partition), multiple of 128 for lane-dense unmasked stores.
    t = min(int(tile), _round_up(n, 128))
    t = max(128, (t // 128) * 128)
    g = (n + t - 1) // t
    n_pad = g * t

    x_pad = x_latent if n_pad == n else jnp.pad(x_latent, ((0, n_pad - n), (0, 0)))

    ls = jnp.asarray(lengthscale, jnp.float32)
    os_ = jnp.asarray(outputscale, jnp.float32)
    inv_ls2 = 1.0 / (ls * ls)
    params = jnp.stack([inv_ls2, jnp.log(os_)]).astype(jnp.float32)

    # Precompute scaled half squared norms once (tiny (N,) work in the wrapper).
    hsq = 0.5 * inv_ls2 * jnp.sum(x_pad * x_pad, axis=-1)
    hsq_row = hsq.reshape(n_pad, 1).astype(jnp.float32)
    hsq_col = hsq.reshape(1, n_pad).astype(jnp.float32)

    # Upper-triangle tile list (i <= j), split across 2 cores; pad to even length
    # by repeating the last tile (duplicate writes of identical data are benign).
    pairs = [(bi, bj) for bi in range(g) for bj in range(bi, g)]
    n_tri = len(pairs)
    steps_per_core = (n_tri + 1) // 2
    total_steps = 2 * steps_per_core
    pairs = pairs + [pairs[-1]] * (total_steps - n_tri)
    iblk = jnp.asarray([p[0] for p in pairs], jnp.int32)
    jblk = jnp.asarray([p[1] for p in pairs], jnp.int32)

    itemsize = jnp.dtype(out_dtype).itemsize
    # VMEM footprint: output staging scratch + double-buffered streamed inputs.
    scratch_bytes = 2 * (2 * t * t * itemsize)                 # tile_buf + mirror_buf
    stream_bytes = 2 * (2 * t * q * 4 + t * 4 + t * 4)         # X blocks + hsq blocks
    footprint = scratch_bytes + stream_bytes
    try:  # generation-aware cap: 64 MiB physical on v7x, 128 MiB on v5e/v6e
        vmem_cap = int(pltpu.get_tpu_info().vmem_capacity_bytes)
    except Exception:
        vmem_cap = 64 * 1024 * 1024
    cap = (3 * vmem_cap) // 4
    vmem_limit = int(min(max(2 * footprint, 32 * 1024 * 1024), cap))
    vmem_limit = max(vmem_limit, footprint + (8 << 20))

    H = steps_per_core
    grid_spec = pltpu.PrefetchScalarGridSpec(
        num_scalar_prefetch=3,                     # iblk, jblk, params
        grid=(2, H),
        in_specs=[
            pl.BlockSpec((t, q), lambda c, h, ib, jb, par: (ib[c * H + h], 0)),
            pl.BlockSpec((t, q), lambda c, h, ib, jb, par: (jb[c * H + h], 0)),
            pl.BlockSpec((t, 1), lambda c, h, ib, jb, par: (ib[c * H + h], 0)),
            pl.BlockSpec((1, t), lambda c, h, ib, jb, par: (0, jb[c * H + h])),
        ],
        out_specs=pl.BlockSpec(memory_space=pl.ANY),   # raw HBM ref; manual DMA writeback
        scratch_shapes=[
            pltpu.VMEM((2, t, t), out_dtype),          # direct tile, double-buffered
            pltpu.VMEM((2, t, t), out_dtype),          # mirrored tile, double-buffered
            pltpu.SemaphoreType.DMA((2, 2)),
        ],
    )

    cost = pl.CostEstimate(
        flops=2 * total_steps * t * t * q,
        transcendentals=total_steps * t * t,
        # Re-streamed X/hsq blocks every step + both writeback streams.
        bytes_accessed=total_steps * (2 * t * q * 4 + 2 * t * 4 + 2 * t * t * itemsize),
    )

    kernel = functools.partial(_gplvm_cov_tri_kernel,
                               steps_per_core=H, bf16_exp=bool(bf16_exp))

    cov_pad = pl.pallas_call(
        kernel,
        out_shape=jax.ShapeDtypeStruct((n_pad, n_pad), out_dtype),
        grid_spec=grid_spec,
        compiler_params=pltpu.CompilerParams(
            dimension_semantics=("parallel", "arbitrary"),
            vmem_limit_bytes=vmem_limit,
        ),
        cost_estimate=cost,
    )(iblk, jblk, params, x_pad, x_pad, hsq_row, hsq_col)

    cov = cov_pad if n_pad == n else cov_pad[:n, :n]

    # ConstantMean: a constant fill — done in the wrapper, not the kernel
    # (a (N,1) kernel output would be a lane-width-1 masked-store stream).
    mean = jnp.full((n,), mean_const, dtype=jnp.float32)
    return mean, cov


def gplvm_init_latents(Y, latent_dim):
    """GPLVM.__init__ latent init: X = U[:, :q] @ diag(S[:q])  (plain-JAX glue)."""
    U, S, _ = jnp.linalg.svd(Y, full_matrices=False)
    return U[:, :latent_dim] * S[:latent_dim][None, :]


if __name__ == "__main__":
    # Small deterministic problem; N chosen so the triangular-tile path is
    # exercised (tile 128 -> 2x2 block grid -> 3 triangle tiles + 1 pad tile,
    # two per core) while staying tiny.
    key = jax.random.PRNGKey(0)
    num_data, data_dim, latent_dim = 256, 16, 4
    Y = jax.random.normal(key, (num_data, data_dim), dtype=jnp.float32)

    # GPLVM.__init__ : latent X from SVD of Y (parameter init).
    X = gplvm_init_latents(Y, latent_dim)

    # gpytorch default hyperparameters (raw=0 -> softplus(0)=ln 2; mean const = 0).
    lengthscale = math.log(2.0)
    outputscale = math.log(2.0)
    mean_const = 0.0

    # GPLVM.forward(X_new) with X_new = X (prior mean / covariance of the GP).
    mean, cov = gplvm_forward(X, lengthscale, outputscale, mean_const,
                              tile=128, out_dtype=jnp.float32)
    jax.block_until_ready((mean, cov))

    # Sanity checks against a pure-JAX reference of the same math.
    xs = X / lengthscale
    sq = jnp.sum(xs * xs, -1)
    d2 = jnp.maximum(sq[:, None] + sq[None, :] - 2.0 * xs @ xs.T, 0.0)
    cov_ref = outputscale * jnp.exp(-0.5 * d2)
    mean_ref = jnp.full((num_data,), mean_const, jnp.float32)
    assert mean.shape == (num_data,) and cov.shape == (num_data, num_data)
    tol = 2e-2 if jnp.dtype(cov.dtype) == jnp.dtype(jnp.bfloat16) else 2e-4
    assert jnp.allclose(cov.astype(jnp.float32), cov_ref, atol=tol, rtol=tol)
    assert jnp.allclose(mean, mean_ref, atol=1e-6)

    # TODO(synk): MultivariateNormal distribution object (sampling / log_prob)
    # and the Adam/MLL optimize() loop have no Pallas equivalent; the kernel
    # returns the (mean, covariance) parameters of the prior MVN.
    print("KERNEL_OK")
</pallas_src>

<mosaic_0001>
module attributes {stable_mosaic.version = 11 : i64} {
  func.func @_gplvm_cov_tri_kernel(%arg0: i32, %arg1: i32, %arg2: memref<4xi32, #tpu.memory_space<smem>>, %arg3: memref<4xi32, #tpu.memory_space<smem>>, %arg4: memref<2xf32, #tpu.memory_space<smem>>, %arg5: memref<128x4xf32, #tpu.memory_space<vmem>>, %arg6: memref<128x4xf32, #tpu.memory_space<vmem>>, %arg7: memref<128x1xf32, #tpu.memory_space<vmem>>, %arg8: memref<1x128xf32, #tpu.memory_space<vmem>>, %arg9: memref<256x256xf32, #tpu.memory_space<any>>, %arg10: memref<2x128x128xf32, #tpu.memory_space<vmem>>, %arg11: memref<2x128x128xf32, #tpu.memory_space<vmem>>, %arg12: memref<2x2x!tpu.dma_semaphore, #tpu.memory_space<semaphore_mem>>) attributes {dimension_semantics = [#tpu.dimension_semantics<parallel>, #tpu.dimension_semantics<arbitrary>], iteration_bounds = array<i64: 2, 2>, scalar_prefetch = 3 : i64, scratch_operands = 3 : i64, tpu.core_type = #tpu.core_type<tc>, window_params = [{transform_indices = @transform_0, window_bounds = array<i64: 128, 4>}, {transform_indices = @transform_1, window_bounds = array<i64: 128, 4>}, {transform_indices = @transform_2, window_bounds = array<i64: 128, 1>}, {transform_indices = @transform_3, window_bounds = array<i64: 1, 128>}, {}]} {
    %c2_i32 = arith.constant 2 : i32
    %c0_i32 = arith.constant 0 : i32
    %0 = arith.cmpi eq, %c2_i32, %c0_i32 : i32
    %c1_i32 = arith.constant 1 : i32
    %1 = arith.select %0, %c1_i32, %c2_i32 : i32
    %2 = arith.remsi %arg1, %1 : i32
    %c0_i32_0 = arith.constant 0 : i32
    %3 = arith.cmpi ne, %2, %c0_i32_0 : i32
    %c0_i32_1 = arith.constant 0 : i32
    %4 = arith.cmpi slt, %2, %c0_i32_1 : i32
    %c0_i32_2 = arith.constant 0 : i32
    %5 = arith.cmpi slt, %1, %c0_i32_2 : i32
    %6 = arith.xori %4, %5 : i1
    %7 = arith.andi %6, %3 : i1
    %8 = arith.addi %2, %1 : i32
    %9 = arith.select %7, %8, %2 : i32
    %c2_i32_3 = arith.constant 2 : i32
    %10 = arith.muli %arg0, %c2_i32_3 : i32
    %11 = arith.addi %10, %arg1 : i32
    %12 = arith.index_cast %11 : i32 to index
    %13 = memref.load %arg2[%12] : memref<4xi32, #tpu.memory_space<smem>>
    %14 = arith.index_cast %11 : i32 to index
    %15 = memref.load %arg3[%14] : memref<4xi32, #tpu.memory_space<smem>>
    %c2_i32_4 = arith.constant 2 : i32
    %16 = arith.cmpi sge, %arg1, %c2_i32_4 : i32
    %17 = arith.extui %16 : i1 to i32
    %c0_i32_5 = arith.constant 0 : i32
    %18 = arith.cmpi ne, %17, %c0_i32_5 : i32
    scf.if %18 {
      %c0_i32_28 = arith.constant 0 : i32
      %c0_i32_29 = arith.constant 0 : i32
      %c0_i32_30 = arith.constant 0 : i32
      %64 = tpu.memref_slice %arg10[%9, %c0_i32_29, %c0_i32_30] : memref<2x128x128xf32, #tpu.memory_space<vmem>> -> memref<1x128x128xf32, #tpu.memory_space<vmem>>
      %65 = tpu.memref_squeeze %64 : memref<1x128x128xf32, #tpu.memory_space<vmem>> -> memref<128x128xf32, #tpu.memory_space<vmem>>
      %c0_i32_31 = arith.constant 0 : i32
      %c0_i32_32 = arith.constant 0 : i32
      %66 = tpu.memref_slice %arg9[%c0_i32_31, %c0_i32_32] : memref<256x256xf32, #tpu.memory_space<any>> -> memref<128x128xf32, #tpu.memory_space<any>>
      %67 = tpu.memref_slice %arg12[%c0_i32_28, %9] : memref<2x2x!tpu.dma_semaphore, #tpu.memory_space<semaphore_mem>> -> memref<1x1x!tpu.dma_semaphore, #tpu.memory_space<semaphore_mem>>
      %68 = tpu.memref_squeeze %67 : memref<1x1x!tpu.dma_semaphore, #tpu.memory_space<semaphore_mem>> -> memref<!tpu.dma_semaphore, #tpu.memory_space<semaphore_mem>>
      tpu.wait_dma2 semaphore(%68 : memref<!tpu.dma_semaphore, #tpu.memory_space<semaphore_mem>>) src(%65 : memref<128x128xf32, #tpu.memory_space<vmem>>) dst(%66 : memref<128x128xf32, #tpu.memory_space<any>>)
      %c1_i32_33 = arith.constant 1 : i32
      %c0_i32_34 = arith.constant 0 : i32
      %c0_i32_35 = arith.constant 0 : i32
      %69 = tpu.memref_slice %arg11[%9, %c0_i32_34, %c0_i32_35] : memref<2x128x128xf32, #tpu.memory_space<vmem>> -> memref<1x128x128xf32, #tpu.memory_space<vmem>>
      %70 = tpu.memref_squeeze %69 : memref<1x128x128xf32, #tpu.memory_space<vmem>> -> memref<128x128xf32, #tpu.memory_space<vmem>>
      %c0_i32_36 = arith.constant 0 : i32
      %c0_i32_37 = arith.constant 0 : i32
      %71 = tpu.memref_slice %arg9[%c0_i32_36, %c0_i32_37] : memref<256x256xf32, #tpu.memory_space<any>> -> memref<128x128xf32, #tpu.memory_space<any>>
      %72 = tpu.memref_slice %arg12[%c1_i32_33, %9] : memref<2x2x!tpu.dma_semaphore, #tpu.memory_space<semaphore_mem>> -> memref<1x1x!tpu.dma_semaphore, #tpu.memory_space<semaphore_mem>>
      %73 = tpu.memref_squeeze %72 : memref<1x1x!tpu.dma_semaphore, #tpu.memory_space<semaphore_mem>> -> memref<!tpu.dma_semaphore, #tpu.memory_space<semaphore_mem>>
      tpu.wait_dma2 semaphore(%73 : memref<!tpu.dma_semaphore, #tpu.memory_space<semaphore_mem>>) src(%70 : memref<128x128xf32, #tpu.memory_space<vmem>>) dst(%71 : memref<128x128xf32, #tpu.memory_space<any>>)
    } else {
    }
    %c0 = arith.constant 0 : index
    %19 = memref.load %arg4[%c0] : memref<2xf32, #tpu.memory_space<smem>>
    %c1 = arith.constant 1 : index
    %20 = memref.load %arg4[%c1] : memref<2xf32, #tpu.memory_space<smem>>
    %c0_6 = arith.constant 0 : index
    %c0_7 = arith.constant 0 : index
    %21 = vector.load %arg5[%c0_6, %c0_7] : memref<128x4xf32, #tpu.memory_space<vmem>>, vector<128x4xf32>
    %22 = vector.broadcast %19 : f32 to vector<128x4xf32>
    %23 = arith.mulf %21, %22 : vector<128x4xf32>
    %c0_8 = arith.constant 0 : index
    %c0_9 = arith.constant 0 : index
    %24 = vector.load %arg6[%c0_8, %c0_9] : memref<128x4xf32, #tpu.memory_space<vmem>>, vector<128x4xf32>
    %cst = arith.constant dense<0.000000e+00> : vector<128x128xf32>
    %25 = tpu.matmul %23, %24, %cst {dimension_numbers = #tpu.dot_dimension_numbers<[1], [1], [0], [0], [0, 0, 1, 0], [], []>} : vector<128x4xf32>, vector<128x4xf32>, vector<128x128xf32> -> vector<128x128xf32>
    %c0_10 = arith.constant 0 : index
    %c0_11 = arith.constant 0 : index
    %26 = vector.load %arg7[%c0_10, %c0_11] : memref<128x1xf32, #tpu.memory_space<vmem>>, vector<128x1xf32>
    %27 = vector.broadcast %26 : vector<128x1xf32> to vector<128x128xf32>
    %28 = arith.subf %25, %27 : vector<128x128xf32>
    %c0_12 = arith.constant 0 : index
    %c0_13 = arith.constant 0 : index
    %29 = vector.load %arg8[%c0_12, %c0_13] : memref<1x128xf32, #tpu.memory_space<vmem>>, vector<1x128xf32>
    %30 = vector.broadcast %29 : vector<1x128xf32> to vector<128x128xf32>
    %31 = arith.subf %28, %30 : vector<128x128xf32>
    %cst_14 = arith.constant 0.000000e+00 : f32
    %32 = vector.broadcast %cst_14 : f32 to vector<128x128xf32>
    %33 = arith.minimumf %31, %32 : vector<128x128xf32>
    %34 = vector.broadcast %20 : f32 to vector<128x128xf32>
    %35 = arith.addf %33, %34 : vector<128x128xf32>
    %36 = math.exp %35 : vector<128x128xf32>
    %37 = arith.index_cast %9 : i32 to index
    %c0_15 = arith.constant 0 : index
    %c0_16 = arith.constant 0 : index
    %38 = vector.load %arg10[%37, %c0_15, %c0_16] : memref<2x128x128xf32, #tpu.memory_space<vmem>>, vector<1x128x128xf32>
    %39 = vector.shape_cast %38 : vector<1x128x128xf32> to vector<128x128xf32>
    %40 = vector.shape_cast %36 : vector<128x128xf32> to vector<1x128x128xf32>
    tpu.vector_store %arg10[%37, %c0_15, %c0_16], %40 {strides = array<i32>} : memref<2x128x128xf32, #tpu.memory_space<vmem>>, vector<1x128x128xf32>,
    %41 = arith.cmpi eq, %13, %15 : i32
    %42 = arith.extui %41 : i1 to i32
    %c0_i32_17 = arith.constant 0 : i32
    %43 = arith.cmpi ne, %42, %c0_i32_17 : i32
    scf.if %43 {
      %64 = arith.index_cast %9 : i32 to index
      %c0_28 = arith.constant 0 : index
      %c0_29 = arith.constant 0 : index
      %65 = vector.load %arg11[%64, %c0_28, %c0_29] : memref<2x128x128xf32, #tpu.memory_space<vmem>>, vector<1x128x128xf32>
      %66 = vector.shape_cast %65 : vector<1x128x128xf32> to vector<128x128xf32>
      %67 = vector.shape_cast %36 : vector<128x128xf32> to vector<1x128x128xf32>
      tpu.vector_store %arg11[%64, %c0_28, %c0_29], %67 {strides = array<i32>} : memref<2x128x128xf32, #tpu.memory_space<vmem>>, vector<1x128x128xf32>,
    } else {
    }
    %44 = arith.cmpi ne, %13, %15 : i32
    %45 = arith.extui %44 : i1 to i32
    %c0_i32_18 = arith.constant 0 : i32
    %46 = arith.cmpi ne, %45, %c0_i32_18 : i32
    scf.if %46 {
      %64 = tpu.transpose %36, [1, 0] : vector<128x128xf32> -> vector<128x128xf32>
      %65 = arith.index_cast %9 : i32 to index
      %c0_28 = arith.constant 0 : index
      %c0_29 = arith.constant 0 : index
      %66 = vector.load %arg11[%65, %c0_28, %c0_29] : memref<2x128x128xf32, #tpu.memory_space<vmem>>, vector<1x128x128xf32>
      %67 = vector.shape_cast %66 : vector<1x128x128xf32> to vector<128x128xf32>
      %68 = vector.shape_cast %64 : vector<128x128xf32> to vector<1x128x128xf32>
      tpu.vector_store %arg11[%65, %c0_28, %c0_29], %68 {strides = array<i32>} : memref<2x128x128xf32, #tpu.memory_space<vmem>>, vector<1x128x128xf32>,
    } else {
    }
    %c128_i32 = arith.constant 128 : i32
    %47 = arith.muli %13, %c128_i32 : i32
    %48 = tpu.assume_multiple %47, 128 : i32
    %c128_i32_19 = arith.constant 128 : i32
    %49 = arith.muli %15, %c128_i32_19 : i32
    %50 = tpu.assume_multiple %49, 128 : i32
    %c0_i32_20 = arith.constant 0 : i32
    %c0_i32_21 = arith.constant 0 : i32
    %c0_i32_22 = arith.constant 0 : i32
    %51 = tpu.memref_slice %arg10[%9, %c0_i32_21, %c0_i32_22] : memref<2x128x128xf32, #tpu.memory_space<vmem>> -> memref<1x128x128xf32, #tpu.memory_space<vmem>>
    %52 = tpu.memref_squeeze %51 : memref<1x128x128xf32, #tpu.memory_space<vmem>> -> memref<128x128xf32, #tpu.memory_space<vmem>>
    %53 = tpu.memref_slice %arg9[%48, %50] : memref<256x256xf32, #tpu.memory_space<any>> -> memref<128x128xf32, #tpu.memory_space<any>>
    %54 = tpu.memref_slice %arg12[%c0_i32_20, %9] : memref<2x2x!tpu.dma_semaphore, #tpu.memory_space<semaphore_mem>> -> memref<1x1x!tpu.dma_semaphore, #tpu.memory_space<semaphore_mem>>
    %55 = tpu.memref_squeeze %54 : memref<1x1x!tpu.dma_semaphore, #tpu.memory_space<semaphore_mem>> -> memref<!tpu.dma_semaphore, #tpu.memory_space<semaphore_mem>>
    tpu.enqueue_dma source(%52 : memref<128x128xf32, #tpu.memory_space<vmem>>) target(%53 : memref<128x128xf32, #tpu.memory_space<any>>) target_semaphore(%55 : memref<!tpu.dma_semaphore, #tpu.memory_space<semaphore_mem>>)
    %c1_i32_23 = arith.constant 1 : i32
    %c0_i32_24 = arith.constant 0 : i32
    %c0_i32_25 = arith.constant 0 : i32
    %56 = tpu.memref_slice %arg11[%9, %c0_i32_24, %c0_i32_25] : memref<2x128x128xf32, #tpu.memory_space<vmem>> -> memref<1x128x128xf32, #tpu.memory_space<vmem>>
    %57 = tpu.memref_squeeze %56 : memref<1x128x128xf32, #tpu.memory_space<vmem>> -> memref<128x128xf32, #tpu.memory_space<vmem>>
    %58 = tpu.memref_slice %arg9[%50, %48] : memref<256x256xf32, #tpu.memory_space<any>> -> memref<128x128xf32, #tpu.memory_space<any>>
    %59 = tpu.memref_slice %arg12[%c1_i32_23, %9] : memref<2x2x!tpu.dma_semaphore, #tpu.memory_space<semaphore_mem>> -> memref<1x1x!tpu.dma_semaphore, #tpu.memory_space<semaphore_mem>>
    %60 = tpu.memref_squeeze %59 : memref<1x1x!tpu.dma_semaphore, #tpu.memory_space<semaphore_mem>> -> memref<!tpu.dma_semaphore, #tpu.memory_space<semaphore_mem>>
    tpu.enqueue_dma source(%57 : memref<128x128xf32, #tpu.memory_space<vmem>>) target(%58 : memref<128x128xf32, #tpu.memory_space<any>>) target_semaphore(%60 : memref<!tpu.dma_semaphore, #tpu.memory_space<semaphore_mem>>)
    %c1_i32_26 = arith.constant 1 : i32
    %61 = arith.cmpi eq, %arg1, %c1_i32_26 : i32
    %62 = arith.extui %61 : i1 to i32
    %c0_i32_27 = arith.constant 0 : i32
    %63 = arith.cmpi ne, %62, %c0_i32_27 : i32
    scf.if %63 {
      %c0_i32_28 = arith.constant 0 : i32
      %c0_i32_29 = arith.constant 0 : i32
      %c0_i32_30 = arith.constant 0 : i32
      %64 = tpu.memref_slice %arg10[%9, %c0_i32_29, %c0_i32_30] : memref<2x128x128xf32, #tpu.memory_space<vmem>> -> memref<1x128x128xf32, #tpu.memory_space<vmem>>
      %65 = tpu.memref_squeeze %64 : memref<1x128x128xf32, #tpu.memory_space<vmem>> -> memref<128x128xf32, #tpu.memory_space<vmem>>
      %c0_i32_31 = arith.constant 0 : i32
      %c0_i32_32 = arith.constant 0 : i32
      %66 = tpu.memref_slice %arg9[%c0_i32_31, %c0_i32_32] : memref<256x256xf32, #tpu.memory_space<any>> -> memref<128x128xf32, #tpu.memory_space<any>>
      %67 = tpu.memref_slice %arg12[%c0_i32_28, %9] : memref<2x2x!tpu.dma_semaphore, #tpu.memory_space<semaphore_mem>> -> memref<1x1x!tpu.dma_semaphore, #tpu.memory_space<semaphore_mem>>
      %68 = tpu.memref_squeeze %67 : memref<1x1x!tpu.dma_semaphore, #tpu.memory_space<semaphore_mem>> -> memref<!tpu.dma_semaphore, #tpu.memory_space<semaphore_mem>>
      tpu.wait_dma2 semaphore(%68 : memref<!tpu.dma_semaphore, #tpu.memory_space<semaphore_mem>>) src(%65 : memref<128x128xf32, #tpu.memory_space<vmem>>) dst(%66 : memref<128x128xf32, #tpu.memory_space<any>>)
      %c1_i32_33 = arith.constant 1 : i32
      %c0_i32_34 = arith.constant 0 : i32
      %c0_i32_35 = arith.constant 0 : i32
      %69 = tpu.memref_slice %arg11[%9, %c0_i32_34, %c0_i32_35] : memref<2x128x128xf32, #tpu.memory_space<vmem>> -> memref<1x128x128xf32, #tpu.memory_space<vmem>>
      %70 = tpu.memref_squeeze %69 : memref<1x128x128xf32, #tpu.memory_space<vmem>> -> memref<128x128xf32, #tpu.memory_space<vmem>>
      %c0_i32_36 = arith.constant 0 : i32
      %c0_i32_37 = arith.constant 0 : i32
      %71 = tpu.memref_slice %arg9[%c0_i32_36, %c0_i32_37] : memref<256x256xf32, #tpu.memory_space<any>> -> memref<128x128xf32, #tpu.memory_space<any>>
      %72 = tpu.memref_slice %arg12[%c1_i32_33, %9] : memref<2x2x!tpu.dma_semaphore, #tpu.memory_space<semaphore_mem>> -> memref<1x1x!tpu.dma_semaphore, #tpu.memory_space<semaphore_mem>>
      %73 = tpu.memref_squeeze %72 : memref<1x1x!tpu.dma_semaphore, #tpu.memory_space<semaphore_mem>> -> memref<!tpu.dma_semaphore, #tpu.memory_space<semaphore_mem>>
      tpu.wait_dma2 semaphore(%73 : memref<!tpu.dma_semaphore, #tpu.memory_space<semaphore_mem>>) src(%70 : memref<128x128xf32, #tpu.memory_space<vmem>>) dst(%71 : memref<128x128xf32, #tpu.memory_space<any>>)
      %c1_i32_38 = arith.constant 1 : i32
      %74 = arith.subi %c1_i32_38, %9 : i32
      %c0_i32_39 = arith.constant 0 : i32
      %c0_i32_40 = arith.constant 0 : i32
      %c0_i32_41 = arith.constant 0 : i32
      %75 = tpu.memref_slice %arg10[%74, %c0_i32_40, %c0_i32_41] : memref<2x128x128xf32, #tpu.memory_space<vmem>> -> memref<1x128x128xf32, #tpu.memory_space<vmem>>
      %76 = tpu.memref_squeeze %75 : memref<1x128x128xf32, #tpu.memory_space<vmem>> -> memref<128x128xf32, #tpu.memory_space<vmem>>
      %c0_i32_42 = arith.constant 0 : i32
      %c0_i32_43 = arith.constant 0 : i32
      %77 = tpu.memref_slice %arg9[%c0_i32_42, %c0_i32_43] : memref<256x256xf32, #tpu.memory_space<any>> -> memref<128x128xf32, #tpu.memory_space<any>>
      %78 = tpu.memref_slice %arg12[%c0_i32_39, %74] : memref<2x2x!tpu.dma_semaphore, #tpu.memory_space<semaphore_mem>> -> memref<1x1x!tpu.dma_semaphore, #tpu.memory_space<semaphore_mem>>
      %79 = tpu.memref_squeeze %78 : memref<1x1x!tpu.dma_semaphore, #tpu.memory_space<semaphore_mem>> -> memref<!tpu.dma_semaphore, #tpu.memory_space<semaphore_mem>>
      tpu.wait_dma2 semaphore(%79 : memref<!tpu.dma_semaphore, #tpu.memory_space<semaphore_mem>>) src(%76 : memref<128x128xf32, #tpu.memory_space<vmem>>) dst(%77 : memref<128x128xf32, #tpu.memory_space<any>>)
      %c1_i32_44 = arith.constant 1 : i32
      %c0_i32_45 = arith.constant 0 : i32
      %c0_i32_46 = arith.constant 0 : i32
      %80 = tpu.memref_slice %arg11[%74, %c0_i32_45, %c0_i32_46] : memref<2x128x128xf32, #tpu.memory_space<vmem>> -> memref<1x128x128xf32, #tpu.memory_space<vmem>>
      %81 = tpu.memref_squeeze %80 : memref<1x128x128xf32, #tpu.memory_space<vmem>> -> memref<128x128xf32, #tpu.memory_space<vmem>>
      %c0_i32_47 = arith.constant 0 : i32
      %c0_i32_48 = arith.constant 0 : i32
      %82 = tpu.memref_slice %arg9[%c0_i32_47, %c0_i32_48] : memref<256x256xf32, #tpu.memory_space<any>> -> memref<128x128xf32, #tpu.memory_space<any>>
      %83 = tpu.memref_slice %arg12[%c1_i32_44, %74] : memref<2x2x!tpu.dma_semaphore, #tpu.memory_space<semaphore_mem>> -> memref<1x1x!tpu.dma_semaphore, #tpu.memory_space<semaphore_mem>>
      %84 = tpu.memref_squeeze %83 : memref<1x1x!tpu.dma_semaphore, #tpu.memory_space<semaphore_mem>> -> memref<!tpu.dma_semaphore, #tpu.memory_space<semaphore_mem>>
      tpu.wait_dma2 semaphore(%84 : memref<!tpu.dma_semaphore, #tpu.memory_space<semaphore_mem>>) src(%81 : memref<128x128xf32, #tpu.memory_space<vmem>>) dst(%82 : memref<128x128xf32, #tpu.memory_space<any>>)
    } else {
    }
    return
  }
  func.func @transform_0(%arg0: i32, %arg1: i32, %arg2: memref<4xi32, #tpu.memory_space<smem>>, %arg3: memref<4xi32, #tpu.memory_space<smem>>, %arg4: memref<2xf32, #tpu.memory_space<smem>>) -> (i32, i32) {
    %c2_i32 = arith.constant 2 : i32
    %0 = arith.muli %arg0, %c2_i32 : i32
    %1 = arith.addi %0, %arg1 : i32
    %2 = arith.index_cast %1 : i32 to index
    %3 = memref.load %arg2[%2] : memref<4xi32, #tpu.memory_space<smem>>
    %c0_i32 = arith.constant 0 : i32
    %c0_i32_0 = arith.constant 0 : i32
    return %3, %c0_i32 : i32, i32
  }
  func.func @transform_1(%arg0: i32, %arg1: i32, %arg2: memref<4xi32, #tpu.memory_space<smem>>, %arg3: memref<4xi32, #tpu.memory_space<smem>>, %arg4: memref<2xf32, #tpu.memory_space<smem>>) -> (i32, i32) {
    %c2_i32 = arith.constant 2 : i32
    %0 = arith.muli %arg0, %c2_i32 : i32
    %1 = arith.addi %0, %arg1 : i32
    %2 = arith.index_cast %1 : i32 to index
    %3 = memref.load %arg3[%2] : memref<4xi32, #tpu.memory_space<smem>>
    %c0_i32 = arith.constant 0 : i32
    %c0_i32_0 = arith.constant 0 : i32
    return %3, %c0_i32 : i32, i32
  }
  func.func @transform_2(%arg0: i32, %arg1: i32, %arg2: memref<4xi32, #tpu.memory_space<smem>>, %arg3: memref<4xi32, #tpu.memory_space<smem>>, %arg4: memref<2xf32, #tpu.memory_space<smem>>) -> (i32, i32) {
    %c2_i32 = arith.constant 2 : i32
    %0 = arith.muli %arg0, %c2_i32 : i32
    %1 = arith.addi %0, %arg1 : i32
    %2 = arith.index_cast %1 : i32 to index
    %3 = memref.load %arg2[%2] : memref<4xi32, #tpu.memory_space<smem>>
    %c0_i32 = arith.constant 0 : i32
    %c0_i32_0 = arith.constant 0 : i32
    return %3, %c0_i32 : i32, i32
  }
  func.func @transform_3(%arg0: i32, %arg1: i32, %arg2: memref<4xi32, #tpu.memory_space<smem>>, %arg3: memref<4xi32, #tpu.memory_space<smem>>, %arg4: memref<2xf32, #tpu.memory_space<smem>>) -> (i32, i32) {
    %c2_i32 = arith.constant 2 : i32
    %0 = arith.muli %arg0, %c2_i32 : i32
    %1 = arith.addi %0, %arg1 : i32
    %2 = arith.index_cast %1 : i32 to index
    %3 = memref.load %arg3[%2] : memref<4xi32, #tpu.memory_space<smem>>
    %c0_i32 = arith.constant 0 : i32
    %c0_i32_0 = arith.constant 0 : i32
    return %c0_i32, %3 : i32, i32
  }
}

</mosaic_0001>

<bundles_post_ra>
// kernel: tpu_custom_call.1
= control target key start
LH: loop header
LB: loop body
LE: loop exit
PB: predicated region body
PF: predicated region fallthrough
CT: control target
= control target key end

     0   :  { %s2044_s0 = inlined_call_operand.vmem [shape: s32[4], index: 0, kind: input, shape index: {}]   ;;  %s2045_s3 = inlined_call_operand.vmem [shape: f32[256,4], index: 3, kind: input, shape index: {}]   ;;  %s2046_s4 = inlined_call_operand.vmem [shape: f32[256,4], index: 4, kind: input, shape index: {}]   ;;  %s2047_s5 = inlined_call_operand.vmem [shape: f32[256,1], index: 5, kind: input, shape index: {}]   ;;  %s2048_s6 = inlined_call_operand.vmem [shape: f32[1,256], index: 6, kind: input, shape index: {}]   ;;  %s2049_s7 = inlined_call_operand.hbm [shape: f32[256,256], index: 7, kind: output, shape index: {}]   ;;  %s2050_s1 = inlined_call_operand.vmem [shape: s32[4], index: 1, kind: input, shape index: {}]   ;;  %s2051_s2 = inlined_call_operand.vmem [shape: f32[2], index: 2, kind: input, shape index: {}]  }
   0x1   :  { %2054 = sst [smem:[#allocation19_spill]] %s2045_s3  ;;  %s12_s26 = sshll.u32 %s2044_s0, 4  ;;  %s13_s26 = int_to_ptr.vmem [resolvable:$true] %s12_s26 }
   0x2   :  { %2055 = sst [smem:[#allocation20_spill]] %s2046_s4  ;;  %s16_s29 = sshll.u32 %s2050_s1, 4  ;;  %s17_s29 = int_to_ptr.vmem [resolvable:$true] %s16_s29 }
   0x3   :  { %2056 = sst [smem:[#allocation21_spill]] %s2047_s5  ;;  %s1395_s30 = scalar_lea.vmem %s13_s26, 16 }
   0x4   :  { %2057 = sst [smem:[#allocation22_spill]] %s2048_s6  ;;  %p1396_p0 = scmp.ne.s32.totalorder %s13_s26, %s1395_s30 }
   0x5   :  { %p1400_p1 = scmp.lt.s32.totalorder %s13_s26, %s13_s26  ;;  %p1401_p2 = scmp.lt.s32.totalorder %s1395_s30, %s1395_s30 }
   0x7   :  { %p1402_p3 = por %p1401_p2, %p1400_p1 }
   0x9   :  { %p1403_p4 = pnand %p1402_p3, %p1396_p0 }
   0xb   :  { %1406 = shalt.err (!%p1403_p4)  }
   0xc   :  { %s1545_s8 = smov [#allocation6]   ;;  %s1407_s9 = scalar_lea.vmem %s17_s29, 16 }
   0xd   :  { %15 = dma.vmem_to_smem %s13_s26, 16, %s1545_s8, [#allocation5] }
   0xe   :  { %p1408_p5 = scmp.ne.s32.totalorder %s17_s29, %s1407_s9  ;;  %p1412_p6 = scmp.lt.s32.totalorder %s17_s29, %s17_s29 }
   0xf   :  { %p1413_p7 = scmp.lt.s32.totalorder %s1407_s9, %s1407_s9 }
  0x11   :  { %p1414_p8 = por %p1413_p7, %p1412_p6 }
  0x13   :  { %p1415_p9 = pnand %p1414_p8, %p1408_p5 }
  0x15   :  { %1418 = shalt.err (!%p1415_p9)  }
  0x16   :  { %s1546_s0 = smov [#allocation7]   ;;  %s20_s11 = sshll.u32 %s2051_s2, 4  ;;  %s21_s11 = int_to_ptr.vmem [resolvable:$true] %s20_s11 }
  0x17   :  { %19 = dma.vmem_to_smem %s17_s29, 16, %s1546_s0, [#allocation5] }
  0x18   :  { %s1419_s12 = scalar_lea.vmem %s21_s11, 16  ;;  %p1424_p11 = scmp.lt.s32.totalorder %s21_s11, %s21_s11 }
  0x19   :  { %p1420_p10 = scmp.ne.s32.totalorder %s21_s11, %s1419_s12  ;;  %p1425_p12 = scmp.lt.s32.totalorder %s1419_s12, %s1419_s12 }
  0x1b   :  { %p1426_p13 = por %p1425_p12, %p1424_p11 }
  0x1d   :  { %p1427_p0 = pnand %p1426_p13, %p1420_p10 }
  0x1f   :  { %1430 = shalt.err (!%p1427_p0)  }
  0x20   :  { %s1547_s13 = smov [#allocation8]  }
  0x21   :  { %23 = dma.vmem_to_smem %s21_s11, 16, %s1547_s13, [#allocation5] }
  0x22   :  { %1499 = dma.done.wait [#allocation5], 48 }
  0x23   :  { %1500 = vsyncadd [#allocation5], 4294967248 }
  0x24   :  { %25 = sfence }
  0x25   :  { %s1603_s14 = smov 0   ;;  %s1605_s15 = smov 0  }
  0x26   :  { %s1607_s16 = smov 0   ;;  %s1609_s2 = smov 0  }
  0x27   :  { %s1611_s17 = smov 0  }
  0x28 LB: > { %s37_s18 = sadd.s32 1, %s1535_s16  ;;  %s40_s19 = sadd.s32 1, %s1539_s2  ;;  %s1543_s17 = sphi %s1611_s17, %s31_s17   ;;  %s1539_s2 = sphi %s1609_s2, %s2071_s2   ;;  %s1535_s16 = sphi %s1607_s16, %s2070_s16   ;;  %s1531_s15 = sphi %s1605_s15, %s2069_s15   ;;  %s1527_s14 = sphi %s1603_s14, %s2068_s14  }
  0x29   : > { %p38_p1 = scmp.ge.s32.totalorder %s37_s18, 2  ;;  %p1088_p3 = scmp.lt.s32.totalorder %s1543_s17, 1 }
  0x2a   : > { %s1089_s20 = sshll.u32 (!%p1088_p3), %s1531_s15, 1  ;;  %p298_p4 = scmp.lt.s32.totalorder (!%p1088_p3), %s1527_s14, 0 }
  0x2b   : > { %s2073_s18 = smov (%p38_p1, %s37_s18), 0  ;;  %s2075_s19 = smov (!%p38_p1, %s40_s19), %s1539_s2 }
  0x2c   : > { %p42_p2 = scmp.ge.s32.totalorder %s2075_s19, 2  ;;  %213 = sbr.rel (%p1088_p3) target bundleno = 650 (0x28a), region = 36 }
  0x2d   : > { %s254_s21 = sadd.s32 (!%p1088_p3), %s1527_s14, %s1089_s20  ;;  %s299_s22 = ssub.s32 (!%p1088_p3), 0, %s1527_s14 }
  0x2e   : > { %s2077_s19 = smov (%p42_p2, %s2075_s19), 0  ;;  %s255_s23 = sld [smem:[#allocation6 + %s254_s21]] (!%p1088_p3) }
  0x2f   : > { %2058 = sst [smem:[#allocation18_spill]] %s2077_s19  ;;  %s1099_s27 = smin.u32 (!%p1088_p3), %s1527_s14, %s299_s22 }
  0x30   : > { %s267_s24 = sld [smem:[#allocation7 + %s254_s21]] (!%p1088_p3)  ;;  %s301_s29 = sand.u32 (!%p1088_p3), 1, %s1099_s27  }
  0x31   : > { %s279_s25 = sld [smem:[#allocation6 + %s254_s21]] (!%p1088_p3)  ;;  %s302_s8 = ssub.s32 (!%p1088_p3), 0, %s301_s29 }
  0x32   : > { %s291_s26 = sld [smem:[#allocation7 + %s254_s21]] (!%p1088_p3)  ;;  %p1312_p10 = scmp.ge.s32.totalorder (!%p1088_p3), %s1527_s14, 2 }
  0x33   : > { %s1638_s28 = sld [smem:[#allocation6 + %s254_s21]]  ;;  %s2079_s8 = smov (!%p298_p4, %s302_s8), %s301_s29 }
  0x34   : > { %s1640_s30 = sld [smem:[#allocation7 + %s254_s21]]  ;;  %s1090_s9 = sshll.u32 %s255_s23, 4 }
  0x35   : > { %p257_p5 = scmp.lt.s32.totalorder %s1090_s9, 31  ;;  %s2059_s3 = sld [smem:[#allocation19_spill]] }
  0x36   : > { %s1093_s0 = sshll.u32 %s267_s24, 4  ;;  %s2060_s4 = sld [smem:[#allocation20_spill]] }
  0x37   : > { %p269_p6 = scmp.lt.s32.totalorder %s1093_s0, 31  ;;  %s1096_s1 = sshll.u32 %s279_s25, 4 }
  0x38   : > { %p292_p7 = scmp.lt.s32.totalorder %s291_s26, 1  ;;  %s2081_s9 = smov (!%p257_p5, %s1090_s9), 31 }
  0x39   : > { %s2083_s0 = smov (!%p269_p6, %s1093_s0), 31  ;;  %s1091_s10 = sshll.u32 %s2081_s9, 3 }
  0x3a   : > { %p281_p8 = scmp.lt.s32.totalorder %s1096_s1, 31  ;;  %s1094_s15 = sshll.u32 %s2083_s0, 3 }
  0x3b   : > { %s1645_s13 = scalar_lea.vmem %s2059_s3, %s1091_s10  ;;  %p1101_p9 = scmp.lt.s32.totalorder %s2079_s8, 0 }
  0x3c   : > { %s1650_s22 = scalar_lea.vmem %s2060_s4, %s1094_s15  ;;  %s2085_s1 = smov (!%p281_p8, %s1096_s1), 31 }
  0x3d   : > { %s2087_s26 = smov (!%p292_p7, %s291_s26), 1  ;;  %s1097_s23 = sshll.u32 %s2085_s1, 3 }
  0x3e   : > { %s308_s24 = sadd.s32 2, %s2079_s8  ;;  %s2061_s5 = sld [smem:[#allocation21_spill]] }
  0x3f   : > { %s2062_s6 = sld [smem:[#allocation22_spill]]  ;;  %s2089_s24 = smov (!%p1101_p9, %s308_s24), %s2079_s8 }
  0x40   : > { %s1667_s11 = scalar_lea.sflag [#allocation4], %s2089_s24 }
  0x44   : > { %s1657_s29 = scalar_lea.vmem %s2061_s5, %s1097_s23 }
  0x45   : > { %s294_s0 = scalar_lea.vmem %s2062_s6, %s2087_s26 }
  0x46   : > { %1502 = dma.done.wait (%p1312_p10), %s1667_s11, 2048 }
  0x47   : > { %1504 = vsyncadd (%p1312_p10), %s1667_s11, 4294965248  ;;  %s1672_s1 = scalar_lea.sflag %s1667_s11, 2 [#allocation4] }
  0x48   : > { %1506 = dma.done.wait (%p1312_p10), %s1672_s1, 2048 }
  0x49   : > { %1508 = vsyncadd (%p1312_p10), %s1672_s1, 4294965248  ;;  %v1548_v0 = vmov 0   ;;  %s327_s8 = sld [smem:[#allocation8]]  ;;  %vm378_vm0 = vcmask 31744   ;;  %v362_v2 = vld [vmem:[%s1650_s22] sm:$0xff]  ;;  %v363_v3 = vld [vmem:[%s1650_s22 + $0x8] sm:$0xff]  ;;  %p1139_p11 = scmp.ne.s32.totalorder %s1638_s28, %s1640_s30 }
  0x4a   : > { %1362 = vset.pattern.permute.xlu1 %v1548_v0  ;;  %1361 = vset.pattern.permute.xlu0 %v1548_v0  ;;  %vm1678_vm1 = vmpackc.low %vm378_vm0, %vm378_vm0  ;;  %v364_v4 = vld [vmem:[%s1650_s22 + $0x10] sm:$0xff]  ;;  %v1240_v5 = vpack.c.bf16 %v363_v3, %v362_v2  ;;  %v365_v6 = vld [vmem:[%s1650_s22 + $0x18] sm:$0xff]  ;;  %s1104_s12 = sld [smem:[#allocation8 + $0x1]]  ;;  %s1866_s26 = sshll.u32 %s2089_s24, 7 }
  0x4b   : > { %v1246_v7 = vpack.c.bf16 %v365_v6, %v364_v4  ;;  %v329_v9 = vld [vmem:[%s1645_s13] sm:$0xff]  ;;  %v367_v12 = vld [vmem:[%s1650_s22 + $0x28] sm:$0xff]  ;;  %v622_v16 = vld [vmem:[%s1657_s29 + $0x10] sm:$0xff]  ;;  %s1884_s20 = scalar_lea.vmem [#allocation2], %s1866_s26  ;;  %s842_s21 = scalar_lea.vmem (!%p1139_p11), [#allocation3], %s1866_s26 }
  0x4c   : > { %1242 = vmatprep.subr.msk.bf16.mxu0 %vm1678_vm1, %v1240_v5  ;;  %1288 = vmatprep.subr.msk.bf16.mxu1 %vm1678_vm1, %v1240_v5  ;;  %v337_v10 = vld [vmem:[%s1645_s13 + $0x40] sm:$0xff]  ;;  %v623_v18 = vld [vmem:[%s1657_s29 + $0x18] sm:$0xff]  ;;  %v368_v19 = vld [vmem:[%s1650_s22 + $0x30] sm:$0xff] }
  0x4d   : > { %1245 = vmatpush3.bf16.xpose.msk.msra.mxu0 %vm1678_vm1, %v1240_v5  ;;  %1296 = vmatpush3.bf16.xpose.msk.msra.mxu1 %vm1678_vm1, %v1240_v5  ;;  %v366_v11 = vld [vmem:[%s1650_s22 + $0x20] sm:$0xff]  ;;  %v369_v20 = vld [vmem:[%s1650_s22 + $0x38] sm:$0xff]  ;;  %v621_v21 = vld [vmem:[%s1657_s29 + $0x8] sm:$0xff] }
  0x4e   : > { %1248 = vmatprep.subr.msk.bf16.mxu0 %vm1678_vm1, %v1246_v7  ;;  %1289 = vmatprep.subr.msk.bf16.mxu1 %vm1678_vm1, %v1246_v7  ;;  %v1252_v15 = vpack.c.bf16 %v367_v12, %v366_v11  ;;  %v620_v17 = vld [vmem:[%s1657_s29] sm:$0xff]  ;;  %v625_v22 = vld [vmem:[%s1657_s29 + $0x28] sm:$0xff]  ;;  %v1258_v23 = vpack.c.bf16 %v369_v20, %v368_v19  ;;  %v627_v25 = vld [vmem:[%s1657_s29 + $0x38] sm:$0xff] }
  0x4f   : > { %v1690_v8 = vstv %s327_s8  ;;  %648 = vperm.xlu1 %1362, %v622_v16   ;;  %638 = vperm.xlu0 %1361, %v620_v17   ;;  %v624_v24 = vld [vmem:[%s1657_s29 + $0x20] sm:$0xff]  ;;  %v371_v27 = vld [vmem:[%s1650_s22 + $0x48] sm:$0xff]  ;;  %v626_v28 = vld [vmem:[%s1657_s29 + $0x30] sm:$0xff] }
  0x50   : > { %v346_v13 = vmul.f32 %v1690_v8, %v329_v9  ;;  %v354_v14 = vmul.f32 %v1690_v8, %v337_v10  ;;  %v370_v26 = vld [vmem:[%s1650_s22 + $0x40] sm:$0xff]  ;;  %v629_v29 = vld [vmem:[%s1657_s29 + $0x48] sm:$0xff]  ;;  %v631_v32 = vld [vmem:[%s1657_s29 + $0x58] sm:$0xff] }
  0x51   : > { %v1264_v30 = vpack.c.bf16 %v371_v27, %v370_v26  ;;  %v628_v31 = vld [vmem:[%s1657_s29 + $0x40] sm:$0xff]  ;;  %v372_v33 = vld [vmem:[%s1650_s22 + $0x50] sm:$0xff]  ;;  %v373_v34 = vld [vmem:[%s1650_s22 + $0x58] sm:$0xff] }
  0x52   : > { %1216 = vmatprep.mubr.msk.f32.mxu0 %vm378_vm0, %v346_v13  ;;  %1228 = vmatprep.mubr.msk.f32.mxu1 %vm378_vm0, %v354_v14  ;;  %v630_v35 = vld [vmem:[%s1657_s29 + $0x50] sm:$0xff]  ;;  %v633_v36 = vld [vmem:[%s1657_s29 + $0x68] sm:$0xff]  ;;  %v1270_v37 = vpack.c.bf16 %v373_v34, %v372_v33  ;;  %v632_v38 = vld [vmem:[%s1657_s29 + $0x60] sm:$0xff]  ;;  %v1845_v34 = vstv %s1104_s12 }
  0x53   : > { %653 = vperm.xlu1 %1362, %v623_v18   ;;  %643 = vperm.xlu0 %1361, %v621_v21   ;;  %v635_v39 = vld [vmem:[%s1657_s29 + $0x78] sm:$0xff]  ;;  %v374_v40 = vld [vmem:[%s1650_s22 + $0x60] sm:$0xff]  ;;  %v375_v41 = vld [vmem:[%s1650_s22 + $0x68] sm:$0xff] }
  0x54   : > { %v634_v42 = vld [vmem:[%s1657_s29 + $0x70] sm:$0xff]  ;;  %v1276_v43 = vpack.c.bf16 %v375_v41, %v374_v40  ;;  %v377_v45 = vld [vmem:[%s1650_s22 + $0x78] sm:$0xff]  ;;  %v330_v47 = vld [vmem:[%s1645_s13 + $0x8] sm:$0xff] }
  0x55   : > { %1251 = vmatpush3.bf16.xpose.msk.msra.mxu0 %vm1678_vm1, %v1246_v7  ;;  %1297 = vmatpush3.bf16.xpose.msk.msra.mxu1 %vm1678_vm1, %v1246_v7  ;;  %v376_v44 = vld [vmem:[%s1650_s22 + $0x70] sm:$0xff]  ;;  %v338_v48 = vld [vmem:[%s1645_s13 + $0x48] sm:$0xff]  ;;  %v347_v51 = vmul.f32 %v1690_v8, %v330_v47  ;;  %v332_v55 = vld [vmem:[%s1645_s13 + $0x18] sm:$0xff] }
  0x56   : > { %1254 = vmatprep.subr.msk.bf16.mxu0 %vm1678_vm1, %v1252_v15  ;;  %1290 = vmatprep.subr.msk.bf16.mxu1 %vm1678_vm1, %v1252_v15  ;;  %v1282_v46 = vpack.c.bf16 %v377_v45, %v376_v44  ;;  %v331_v49 = vld [vmem:[%s1645_s13 + $0x10] sm:$0xff]  ;;  %v355_v52 = vmul.f32 %v1690_v8, %v338_v48  ;;  %v340_v56 = vld [vmem:[%s1645_s13 + $0x58] sm:$0xff]  ;;  %v333_v57 = vld [vmem:[%s1645_s13 + $0x20] sm:$0xff]  ;;  %v349_v59 = vmul.f32 %v1690_v8, %v332_v55 }
  0x57   : > { %663 = vperm.xlu1 %1362, %v625_v22   ;;  %658 = vperm.xlu0 %1361, %v624_v24   ;;  %v339_v50 = vld [vmem:[%s1645_s13 + $0x50] sm:$0xff]  ;;  %v348_v53 = vmul.f32 %v1690_v8, %v331_v49  ;;  %v341_v58 = vld [vmem:[%s1645_s13 + $0x60] sm:$0xff]  ;;  %v357_v60 = vmul.f32 %v1690_v8, %v340_v56  ;;  %v350_v61 = vmul.f32 %v1690_v8, %v333_v57  ;;  %v334_v63 = vld [vmem:[%s1645_s13 + $0x28] sm:$0xff] }
  0x58   : > { %v356_v54 = vmul.f32 %v1690_v8, %v339_v50  ;;  %v358_v62 = vmul.f32 %v1690_v8, %v341_v58  ;;  %v342_v0 = vld [vmem:[%s1645_s13 + $0x68] sm:$0xff]  ;;  %v335_v1 = vld [vmem:[%s1645_s13 + $0x30] sm:$0xff]  ;;  %v351_v3 = vmul.f32 %v1690_v8, %v334_v63  ;;  %v336_v7 = vld [vmem:[%s1645_s13 + $0x38] sm:$0xff] }
  0x59   : > { %v343_v2 = vld [vmem:[%s1645_s13 + $0x70] sm:$0xff]  ;;  %v359_v4 = vmul.f32 %v1690_v8, %v342_v0  ;;  %v352_v5 = vmul.f32 %v1690_v8, %v335_v1  ;;  %v344_v9 = vld [vmem:[%s1645_s13 + $0x78] sm:$0xff]  ;;  %v353_v10 = vmul.f32 %v1690_v8, %v336_v7  ;;  %v1841_v22 = vld [vmem:[%s294_s0] ss:$0 sm:$0xff] }
  0x5a   : > { %v360_v6 = vmul.f32 %v1690_v8, %v343_v2  ;;  %v361_v11 = vmul.f32 %v1690_v8, %v344_v9 }
  0x5b   : > { %673 = vperm.xlu1 %1362, %v627_v25   ;;  %668 = vperm.xlu0 %1361, %v626_v28  }
  0x5d   : > { %1257 = vmatpush3.bf16.xpose.msk.msra.mxu0 %vm1678_vm1, %v1252_v15  ;;  %1298 = vmatpush3.bf16.xpose.msk.msra.mxu1 %vm1678_vm1, %v1252_v15 }
  0x5e   : > { %1260 = vmatprep.subr.msk.bf16.mxu0 %vm1678_vm1, %v1258_v23  ;;  %1291 = vmatprep.subr.msk.bf16.mxu1 %vm1678_vm1, %v1258_v23 }
  0x5f   : > { %683 = vperm.xlu1 %1362, %v629_v29   ;;  %678 = vperm.xlu0 %1361, %v628_v31  }
  0x63   : > { %693 = vperm.xlu1 %1362, %v631_v32   ;;  %688 = vperm.xlu0 %1361, %v630_v35  }
  0x65   : > { %1263 = vmatpush3.bf16.xpose.msk.msra.mxu0 %vm1678_vm1, %v1258_v23  ;;  %1299 = vmatpush3.bf16.xpose.msk.msra.mxu1 %vm1678_vm1, %v1258_v23 }
  0x66   : > { %1266 = vmatprep.subr.msk.bf16.mxu0 %vm1678_vm1, %v1264_v30  ;;  %1292 = vmatprep.subr.msk.bf16.mxu1 %vm1678_vm1, %v1264_v30 }
  0x67   : > { %703 = vperm.xlu1 %1362, %v633_v36   ;;  %698 = vperm.xlu0 %1361, %v632_v38  }
  0x6b   : > { %713 = vperm.xlu1 %1362, %v635_v39   ;;  %708 = vperm.xlu0 %1361, %v634_v42  }
  0x6d   : > { %1269 = vmatpush3.bf16.xpose.msk.msra.mxu0 %vm1678_vm1, %v1264_v30  ;;  %1300 = vmatpush3.bf16.xpose.msk.msra.mxu1 %vm1678_vm1, %v1264_v30 }
  0x6e   : > { %1272 = vmatprep.subr.msk.bf16.mxu0 %vm1678_vm1, %v1270_v37  ;;  %1293 = vmatprep.subr.msk.bf16.mxu1 %vm1678_vm1, %v1270_v37 }
  0x75   : > { %1275 = vmatpush3.bf16.xpose.msk.msra.mxu0 %vm1678_vm1, %v1270_v37  ;;  %1301 = vmatpush3.bf16.xpose.msk.msra.mxu1 %vm1678_vm1, %v1270_v37 }
  0x76   : > { %1278 = vmatprep.subr.msk.bf16.mxu0 %vm1678_vm1, %v1276_v43  ;;  %1294 = vmatprep.subr.msk.bf16.mxu1 %vm1678_vm1, %v1276_v43 }
  0x7d   : > { %1281 = vmatpush3.bf16.xpose.msk.msra.mxu0 %vm1678_vm1, %v1276_v43  ;;  %1302 = vmatpush3.bf16.xpose.msk.msra.mxu1 %vm1678_vm1, %v1276_v43 }
  0x7e   : > { %1284 = vmatprep.subr.msk.bf16.mxu0 %vm1678_vm1, %v1282_v46  ;;  %1295 = vmatprep.subr.msk.bf16.mxu1 %vm1678_vm1, %v1282_v46 }
  0x85   : > { %1287 = vmatpush3.bf16.xpose.msk.msra.mxu0 %vm1678_vm1, %v1282_v46  ;;  %1303 = vmatpush3.bf16.xpose.msk.msra.mxu1 %vm1678_vm1, %v1282_v46 }
  0x8c   : > { %1217 = vmatmul.mubr.msk.f32.vlgmr.msra.gmra.mrb[0].mxu0 %vm378_vm0, %v347_v51  ;;  %1229 = vmatmul.mubr.msk.f32.vlgmr.msra.gmra.mrb[0].mxu1 %vm378_vm0, %v355_v52 }
  0x8d   : > { %1219 = vmatprep.mubr.msk.f32.mxu0 %vm378_vm0, %v348_v53  ;;  %1231 = vmatprep.mubr.msk.f32.mxu1 %vm378_vm0, %v356_v54 }
  0x90   : > { %1220 = vmatmul.mubr.msk.f32.gmra.mrb[2].mxu0 %vm378_vm0, %v349_v59  ;;  %1232 = vmatmul.mubr.msk.f32.gmra.mrb[2].mxu1 %vm378_vm0, %v357_v60 }
  0x91   : > { %1222 = vmatprep.mubr.msk.f32.mxu0 %vm378_vm0, %v350_v61  ;;  %1234 = vmatprep.mubr.msk.f32.mxu1 %vm378_vm0, %v358_v62 }
  0x94   : > { %1223 = vmatmul.mubr.msk.f32.gmra.mrb[4].mxu0 %vm378_vm0, %v351_v3  ;;  %1235 = vmatmul.mubr.msk.f32.gmra.mrb[4].mxu1 %vm378_vm0, %v359_v4 }
  0x95   : > { %1225 = vmatprep.mubr.msk.f32.mxu0 %vm378_vm0, %v352_v5  ;;  %1237 = vmatprep.mubr.msk.f32.mxu1 %vm378_vm0, %v360_v6 }
  0x98   : > { %1226 = vmatmul.mubr.msk.f32.gmra.mrb[6].mxu0 %vm378_vm0, %v353_v10  ;;  %1238 = vmatmul.mubr.msk.f32.gmra.mrb[6].mxu1 %vm378_vm0, %v361_v11 }
  0xce   : > { %v649_v12 = vpop.permute.xlu1 %648  ;;  %v639_v13 = vpop.permute.xlu0 %638 }
  0xd2   : > { %v654_v14 = vpop.permute.xlu1 %653  ;;  %v644_v15 = vpop.permute.xlu0 %643 }
  0xd6   : > { %v1828_v16 = vpop.permute.xlu1 %663  ;;  %v1830_v17 = vpop.permute.xlu0 %658 }
  0xda   : > { %v1832_v18 = vpop.permute.xlu1 %673  ;;  %v1834_v8 = vpop.permute.xlu0 %668 }
  0xde   : > { %v684_v19 = vpop.permute.xlu1 %683  ;;  %v679_v20 = vpop.permute.xlu0 %678 }
  0xe2   : > { %v694_v30 = vpop.permute.xlu1 %693  ;;  %v689_v31 = vpop.permute.xlu0 %688 }
  0xe6   : > { %v704_v59 = vpop.permute.xlu1 %703  ;;  %v699_v0 = vpop.permute.xlu0 %698 }
 0x15f   : > { %v1218_v21 = vpop.f32.mrb[0].mxu0  ;;  %v1230_v23 = vpop.f32.mrb[0].mxu1 }
 0x160   : > { %v717_v24 = vsub.f32 %v1218_v21, %v644_v15  ;;  %v725_v25 = vsub.f32 %v1230_v23, %v684_v19  ;;  %v541_v26 = vpop.f32.mrb[1].mxu0  ;;  %v581_v27 = vpop.f32.mrb[1].mxu1 }
 0x161   : > { %v716_v28 = vsub.f32 %v541_v26, %v639_v13  ;;  %v724_v29 = vsub.f32 %v581_v27, %v679_v20  ;;  %v714_v27 = vpop.permute.xlu1 %713 }
 0x162   : > { %v740_v32 = vsub.f32 %v717_v24, %v1841_v22  ;;  %v748_v33 = vsub.f32 %v725_v25, %v1841_v22 }
 0x163   : > { %v739_v35 = vsub.f32 %v716_v28, %v1841_v22  ;;  %v747_v36 = vsub.f32 %v724_v29, %v1841_v22  ;;  %v1221_v37 = vpop.f32.mrb[2].mxu0  ;;  %v1233_v38 = vpop.f32.mrb[2].mxu1 }
 0x164   : > { %v756_v39 = vmin.f32 %v740_v32, 0.0  ;;  %v764_v40 = vmin.f32 %v748_v33, 0.0  ;;  %v719_v41 = vsub.f32 %v1221_v37, %v654_v14  ;;  %v727_v42 = vsub.f32 %v1233_v38, %v694_v30  ;;  %v551_v43 = vpop.f32.mrb[3].mxu0  ;;  %v591_v44 = vpop.f32.mrb[3].mxu1 }
 0x165   : > { %v755_v45 = vmin.f32 %v739_v35, 0.0  ;;  %v763_v46 = vmin.f32 %v747_v36, 0.0  ;;  %v718_v47 = vsub.f32 %v551_v43, %v649_v12  ;;  %v726_v48 = vsub.f32 %v591_v44, %v689_v31 }
 0x166   : > { %v773_v49 = vadd.f32 %v1845_v34, %v756_v39  ;;  %v781_v50 = vadd.f32 %v1845_v34, %v764_v40  ;;  %v742_v51 = vsub.f32 %v719_v41, %v1841_v22  ;;  %v750_v52 = vsub.f32 %v727_v42, %v1841_v22  ;;  %v709_v40 = vpop.permute.xlu0 %708 }
 0x167   : > { %v772_v53 = vadd.f32 %v1845_v34, %v755_v45  ;;  %v780_v54 = vadd.f32 %v1845_v34, %v763_v46  ;;  %v741_v55 = vsub.f32 %v718_v47, %v1841_v22  ;;  %v749_v56 = vsub.f32 %v726_v48, %v1841_v22  ;;  %v1224_v57 = vpop.f32.mrb[4].mxu0  ;;  %v1236_v58 = vpop.f32.mrb[4].mxu1 }
 0x168   : > { %v790_v60 = vmul.f32 1.442695, %v773_v49  ;;  %v806_v61 = vmul.f32 1.442695, %v781_v50  ;;  %v758_v62 = vmin.f32 %v742_v51, 0.0  ;;  %v766_v63 = vmin.f32 %v750_v52, 0.0 }
 0x169   : > { %v788_v1 = vmul.f32 1.442695, %v772_v53  ;;  %v804_v2 = vmul.f32 1.442695, %v780_v54  ;;  %v757_v3 = vmin.f32 %v741_v55, 0.0  ;;  %v765_v4 = vmin.f32 %v749_v56, 0.0 }
 0x16a   : > { %1363 = vpow2.f32 %v790_v60  ;;  %v775_v5 = vadd.f32 %v1845_v34, %v758_v62  ;;  %v783_v6 = vadd.f32 %v1845_v34, %v766_v63  ;;  %v721_v7 = vsub.f32 %v1224_v57, %v1828_v16  ;;  %v561_v9 = vpop.f32.mrb[5].mxu0  ;;  %v601_v10 = vpop.f32.mrb[5].mxu1 }
 0x16b   : > { %1365 = vpow2.f32 %v806_v61  ;;  %v774_v11 = vadd.f32 %v1845_v34, %v757_v3  ;;  %v782_v12 = vadd.f32 %v1845_v34, %v765_v4  ;;  %v729_v13 = vsub.f32 %v1236_v58, %v704_v59  ;;  %v1227_v14 = vpop.f32.mrb[6].mxu0  ;;  %v1239_v15 = vpop.f32.mrb[6].mxu1 }
 0x16c   : > { %1367 = vpow2.f32 %v788_v1  ;;  %v794_v19 = vmul.f32 1.442695, %v775_v5  ;;  %v810_v20 = vmul.f32 1.442695, %v783_v6  ;;  %v744_v21 = vsub.f32 %v721_v7, %v1841_v22  ;;  %v571_v23 = vpop.f32.mrb[7].mxu0  ;;  %v611_v24 = vpop.f32.mrb[7].mxu1 }
 0x16d   : > { %1369 = vpow2.f32 %v804_v2  ;;  %v792_v16 = vmul.f32 1.442695, %v774_v11  ;;  %v808_v25 = vmul.f32 1.442695, %v782_v12  ;;  %v752_v26 = vsub.f32 %v729_v13, %v1841_v22 }
 0x16e   : > { %1371 = vpow2.f32 %v794_v19  ;;  %v760_v28 = vmin.f32 %v744_v21, 0.0  ;;  %v720_v29 = vsub.f32 %v561_v9, %v1830_v17  ;;  %v728_v30 = vsub.f32 %v601_v10, %v699_v0 }
 0x16f   : > { %1373 = vpow2.f32 %v810_v20  ;;  %v768_v31 = vmin.f32 %v752_v26, 0.0  ;;  %v723_v32 = vsub.f32 %v1227_v14, %v1832_v18  ;;  %v731_v33 = vsub.f32 %v1239_v15, %v714_v27 }
 0x170   : > { %1375 = vpow2.f32 %v792_v16  ;;  %v777_v35 = vadd.f32 %v1845_v34, %v760_v28  ;;  %v743_v36 = vsub.f32 %v720_v29, %v1841_v22  ;;  %v751_v37 = vsub.f32 %v728_v30, %v1841_v22 }
 0x171   : > { %1377 = vpow2.f32 %v808_v25  ;;  %v785_v38 = vadd.f32 %v1845_v34, %v768_v31  ;;  %v746_v17 = vsub.f32 %v723_v32, %v1841_v22  ;;  %v754_v39 = vsub.f32 %v731_v33, %v1841_v22 }
 0x172   : > { %v798_v41 = vmul.f32 1.442695, %v777_v35  ;;  %v759_v42 = vmin.f32 %v743_v36, 0.0  ;;  %v767_v18 = vmin.f32 %v751_v37, 0.0  ;;  %v722_v43 = vsub.f32 %v571_v23, %v1834_v8 }
 0x173   : > { %v814_v44 = vmul.f32 1.442695, %v785_v38  ;;  %v762_v45 = vmin.f32 %v746_v17, 0.0  ;;  %v770_v46 = vmin.f32 %v754_v39, 0.0  ;;  %v730_v47 = vsub.f32 %v611_v24, %v709_v40 }
 0x174   : > { %v1876_v48 = vpop.eup %1363  ;;  %1379 = vpow2.f32 %v798_v41  ;;  %v776_v49 = vadd.f32 %v1845_v34, %v759_v42  ;;  %v784_v50 = vadd.f32 %v1845_v34, %v767_v18  ;;  %v745_v51 = vsub.f32 %v722_v43, %v1841_v22 }
 0x175   : > { %v1881_v52 = vpop.eup %1365  ;;  %823 = vst [vmem:[%s1884_s20 + $0x8] sm:$0xff] %v1876_v48  ;;  %1381 = vpow2.f32 %v814_v44  ;;  %v779_v8 = vadd.f32 %v1845_v34, %v762_v45  ;;  %v787_v53 = vadd.f32 %v1845_v34, %v770_v46  ;;  %v753_v54 = vsub.f32 %v730_v47, %v1841_v22  ;;  %844 = vst [vmem:[%s842_s21 + $0x8] sm:$0xff] (!%p1139_p11), %v1876_v48 }
 0x176   : > { %v1891_v55 = vpop.eup %1367  ;;  %831 = vst [vmem:[%s1884_s20 + $0x48] sm:$0xff] %v1881_v52  ;;  %v796_v56 = vmul.f32 1.442695, %v776_v49  ;;  %v812_v57 = vmul.f32 1.442695, %v784_v50  ;;  %v761_v58 = vmin.f32 %v745_v51, 0.0 }
 0x177   : > { %v1895_v59 = vpop.eup %1369  ;;  %822 = vst [vmem:[%s1884_s20] sm:$0xff] %v1891_v55  ;;  %v802_v60 = vmul.f32 1.442695, %v779_v8  ;;  %v818_v61 = vmul.f32 1.442695, %v787_v53  ;;  %v769_v62 = vmin.f32 %v753_v54, 0.0  ;;  %843 = vst [vmem:[%s842_s21] sm:$0xff] (!%p1139_p11), %v1891_v55 }
 0x178   : > { %v1372_v63 = vpop.eup %1371  ;;  %830 = vst [vmem:[%s1884_s20 + $0x40] sm:$0xff] %v1895_v59  ;;  %1383 = vpow2.f32 %v796_v56  ;;  %v778_v22 = vadd.f32 %v1845_v34, %v761_v58  ;;  %851 = vst [vmem:[%s842_s21 + $0x40] sm:$0xff] (!%p1139_p11), %v1895_v59 }
 0x179   : > { %v1902_v0 = vpop.eup %1373  ;;  %825 = vst [vmem:[%s1884_s20 + $0x18] sm:$0xff] %v1372_v63  ;;  %1385 = vpow2.f32 %v812_v57  ;;  %v786_v1 = vadd.f32 %v1845_v34, %v769_v62  ;;  %846 = vst [vmem:[%s842_s21 + $0x18] sm:$0xff] (!%p1139_p11), %v1372_v63 }
 0x17a   : > { %v1376_v2 = vpop.eup %1375  ;;  %833 = vst [vmem:[%s1884_s20 + $0x58] sm:$0xff] %v1902_v0  ;;  %1387 = vpow2.f32 %v802_v60  ;;  %v800_v3 = vmul.f32 1.442695, %v778_v22  ;;  %852 = vst [vmem:[%s842_s21 + $0x48] sm:$0xff] (!%p1139_p11), %v1881_v52 }
 0x17b   : > { %v1378_v4 = vpop.eup %1377  ;;  %824 = vst [vmem:[%s1884_s20 + $0x10] sm:$0xff] %v1376_v2  ;;  %1389 = vpow2.f32 %v818_v61  ;;  %v816_v5 = vmul.f32 1.442695, %v786_v1  ;;  %845 = vst [vmem:[%s842_s21 + $0x10] sm:$0xff] (!%p1139_p11), %v1376_v2 }
 0x17c   : > { %832 = vst [vmem:[%s1884_s20 + $0x50] sm:$0xff] %v1378_v4  ;;  %1391 = vpow2.f32 %v800_v3  ;;  %853 = vst [vmem:[%s842_s21 + $0x50] sm:$0xff] (!%p1139_p11), %v1378_v4 }
 0x17d   : > { %1393 = vpow2.f32 %v816_v5  ;;  %854 = vst [vmem:[%s842_s21 + $0x58] sm:$0xff] (!%p1139_p11), %v1902_v0 }
 0x17e   : > { %v1380_v6 = vpop.eup %1379 }
 0x17f   : > { %v1382_v34 = vpop.eup %1381  ;;  %827 = vst [vmem:[%s1884_s20 + $0x28] sm:$0xff] %v1380_v6  ;;  %848 = vst [vmem:[%s842_s21 + $0x28] sm:$0xff] (!%p1139_p11), %v1380_v6 }
 0x180   : > { %835 = vst [vmem:[%s1884_s20 + $0x68] sm:$0xff] %v1382_v34  ;;  %856 = vst [vmem:[%s842_s21 + $0x68] sm:$0xff] (!%p1139_p11), %v1382_v34 }
 0x182   : > { %v1384_v7 = vpop.eup %1383  ;;  %841 = sbr.rel (%p1139_p11) target bundleno = 393 (0x189), region = 44 }
 0x183   : > { %v1386_v9 = vpop.eup %1385  ;;  %826 = vst [vmem:[%s1884_s20 + $0x20] sm:$0xff] %v1384_v7  ;;  %847 = vst [vmem:[%s842_s21 + $0x20] sm:$0xff] (!%p1139_p11), %v1384_v7 }
 0x184   : > { %v1388_v10 = vpop.eup %1387  ;;  %834 = vst [vmem:[%s1884_s20 + $0x60] sm:$0xff] %v1386_v9  ;;  %855 = vst [vmem:[%s842_s21 + $0x60] sm:$0xff] (!%p1139_p11), %v1386_v9 }
 0x185   : > { %v1390_v11 = vpop.eup %1389  ;;  %829 = vst [vmem:[%s1884_s20 + $0x38] sm:$0xff] %v1388_v10  ;;  %850 = vst [vmem:[%s842_s21 + $0x38] sm:$0xff] (!%p1139_p11), %v1388_v10 }
 0x186   : > { %v1392_v12 = vpop.eup %1391  ;;  %837 = vst [vmem:[%s1884_s20 + $0x78] sm:$0xff] %v1390_v11  ;;  %858 = vst [vmem:[%s842_s21 + $0x78] sm:$0xff] (!%p1139_p11), %v1390_v11 }
 0x187   : > { %v1394_v13 = vpop.eup %1393  ;;  %828 = vst [vmem:[%s1884_s20 + $0x30] sm:$0xff] %v1392_v12  ;;  %849 = vst [vmem:[%s842_s21 + $0x30] sm:$0xff] (!%p1139_p11), %v1392_v12 }
 0x188   : > { %836 = vst [vmem:[%s1884_s20 + $0x70] sm:$0xff] %v1394_v13  ;;  %857 = vst [vmem:[%s842_s21 + $0x70] sm:$0xff] (!%p1139_p11), %v1394_v13 }
 0x189 PF: > { %p1140_p12 = scmp.eq.s32.totalorder %s1638_s28, %s1640_s30 }
 0x18a   : > { %863 = vxpose.xlu0.b32.start [1/16] (!%p1140_p12), %v1891_v55, 128  ;;  %s1934_s22 = scalar_lea.vmem (!%p1140_p12), [#allocation3], %s1866_s26 }
 0x18b   : > { %862 = sbr.rel (%p1140_p12) target bundleno = 584 (0x248), region = 48 }
 0x18e   : > { %864 = vxpose.xlu0.b32.cont [2/16] (!%p1140_p12), %v1876_v48, 128 }
 0x192   : > { %865 = vxpose.xlu0.b32.cont [3/16] %v1376_v2, 128 }
 0x196   : > { %866 = vxpose.xlu0.b32.cont [4/16] %v1372_v63, 128 }
 0x19a   : > { %867 = vxpose.xlu0.b32.cont [5/16] %v1384_v7, 128 }
 0x19e   : > { %868 = vxpose.xlu0.b32.cont [6/16] %v1380_v6, 128 }
 0x1a2   : > { %869 = vxpose.xlu0.b32.cont [7/16] %v1392_v12, 128 }
 0x1a6   : > { %870 = vxpose.xlu0.b32.cont [8/16] %v1388_v10, 128 }
 0x1aa   : > { %871 = vxpose.xlu0.b32.cont [9/16] %v1895_v59, 128 }
 0x1ae   : > { %872 = vxpose.xlu0.b32.cont [10/16] %v1881_v52, 128 }
 0x1b2   : > { %873 = vxpose.xlu0.b32.cont [11/16] %v1378_v4, 128 }
 0x1b6   : > { %874 = vxpose.xlu0.b32.cont [12/16] %v1902_v0, 128 }
 0x1ba   : > { %875 = vxpose.xlu0.b32.cont [13/16] %v1386_v9, 128 }
 0x1be   : > { %876 = vxpose.xlu0.b32.cont [14/16] %v1382_v34, 128 }
 0x1c2   : > { %877 = vxpose.xlu0.b32.cont [15/16] %v1394_v13, 128 }
 0x1c6   : > { %878 = vxpose.xlu0.b32.end [16/16] %v1390_v11, 128 }
 0x20a   : > { %v879_v14 = vpop.trf.xlu0 }
 0x20b   : > { %896 = vst [vmem:[%s1934_s22] sm:$0xff] %v879_v14 }
 0x20e   : > { %v880_v15 = vpop.trf.xlu0 }
 0x20f   : > { %897 = vst [vmem:[%s1934_s22 + $0x8] sm:$0xff] %v880_v15 }
 0x212   : > { %v881_v19 = vpop.trf.xlu0 }
 0x213   : > { %898 = vst [vmem:[%s1934_s22 + $0x10] sm:$0xff] %v881_v19 }
 0x216   : > { %v882_v20 = vpop.trf.xlu0 }
 0x217   : > { %899 = vst [vmem:[%s1934_s22 + $0x18] sm:$0xff] %v882_v20 }
 0x21a   : > { %v883_v21 = vpop.trf.xlu0 }
 0x21b   : > { %900 = vst [vmem:[%s1934_s22 + $0x20] sm:$0xff] %v883_v21 }
 0x21e   : > { %v884_v23 = vpop.trf.xlu0 }
 0x21f   : > { %901 = vst [vmem:[%s1934_s22 + $0x28] sm:$0xff] %v884_v23 }
 0x222   : > { %v885_v24 = vpop.trf.xlu0 }
 0x223   : > { %902 = vst [vmem:[%s1934_s22 + $0x30] sm:$0xff] %v885_v24 }
 0x226   : > { %v886_v16 = vpop.trf.xlu0 }
 0x227   : > { %903 = vst [vmem:[%s1934_s22 + $0x38] sm:$0xff] %v886_v16 }
 0x22a   : > { %v887_v25 = vpop.trf.xlu0 }
 0x22b   : > { %904 = vst [vmem:[%s1934_s22 + $0x40] sm:$0xff] %v887_v25 }
 0x22e   : > { %v888_v26 = vpop.trf.xlu0 }
 0x22f   : > { %905 = vst [vmem:[%s1934_s22 + $0x48] sm:$0xff] %v888_v26 }
 0x232   : > { %v889_v27 = vpop.trf.xlu0 }
 0x233   : > { %906 = vst [vmem:[%s1934_s22 + $0x50] sm:$0xff] %v889_v27 }
 0x236   : > { %v890_v28 = vpop.trf.xlu0 }
 0x237   : > { %907 = vst [vmem:[%s1934_s22 + $0x58] sm:$0xff] %v890_v28 }
 0x23a   : > { %v891_v29 = vpop.trf.xlu0 }
 0x23b   : > { %908 = vst [vmem:[%s1934_s22 + $0x60] sm:$0xff] %v891_v29 }
 0x23e   : > { %v892_v30 = vpop.trf.xlu0 }
 0x23f   : > { %909 = vst [vmem:[%s1934_s22 + $0x68] sm:$0xff] %v892_v30 }
 0x242   : > { %v893_v31 = vpop.trf.xlu0 }
 0x243   : > { %910 = vst [vmem:[%s1934_s22 + $0x70] sm:$0xff] %v893_v31 }
 0x246   : > { %v894_v32 = vpop.trf.xlu0 }
 0x247   : > { %911 = vst [vmem:[%s1934_s22 + $0x78] sm:$0xff] %v894_v32 }
 0x248 PF: > { %s1141_s23 = sshll.u32 %s1638_s28, 7  ;;  %s2052_s25 = sshll.u32 %s1640_s30, 7 }
 0x249   : > { %s914_s27 = sshra.s32 %s2052_s25, 7  ;;  %s916_s29 = sshra.s32 %s1141_s23, 3 }
 0x24a   : > { %s1143_s9 = sshll.u32 %s916_s29, 1  ;;  %s924_s10 = sshll.u32 %s1884_s20, 4  ;;  %s1957_s10 = int_to_ptr.vmem [resolvable:$true] %s924_s10 }
 0x24b   : > { %s919_s0 = sadd.s32 %s1143_s9, %s914_s27  ;;  %s1964_s21 = sshra.s32 %s1141_s23, 7 }
 0x24c   : > { %s1144_s8 = sshll.u32 %s919_s0, 7  ;;  %s1431_s28 = scalar_lea.vmem %s1957_s10, 2048 }
 0x24d   : > { %s1962_s15 = scalar_lea.hbm %s2049_s7, %s1144_s8  ;;  %p1432_p13 = scmp.ne.s32.totalorder %s1957_s10, %s1431_s28 }
 0x24e   : > { %s1549_s22 = smov [#allocation2]  }
 0x24f   : > { %s1433_s25 = sshll.u32 %s1549_s22, 4  ;;  %s1434_s25 = int_to_ptr.vmem [resolvable:$false] %s1433_s25 }
 0x250   : > { %s1435_s20 = scalar_lea.vmem %s1434_s25, 4096  ;;  %p1436_p0 = scmp.lt.s32.totalorder %s1957_s10, %s1434_s25 }
 0x251   : > { %p1437_p1 = scmp.lt.s32.totalorder %s1435_s20, %s1431_s28 }
 0x253   : > { %p1438_p2 = por %p1437_p1, %p1436_p0 }
 0x255   : > { %p1439_p3 = pnand %p1438_p2, %p1432_p13 }
 0x257   : > { %1442 = shalt.err (!%p1439_p3)  }
 0x258   : > { %s1443_s27 = scalar_lea.hbm %s1962_s15, 2048  ;;  %s2053_s9 = scalar_lea.hbm %s2049_s7, 8192 }
 0x259   : > { %p1444_p4 = scmp.ne.s32.totalorder %s1962_s15, %s1443_s27  ;;  %p1446_p5 = scmp.lt.u32.totalorder %s1962_s15, %s2049_s7 }
 0x25a   : > { %p1447_p6 = scmp.lt.u32.totalorder %s2053_s9, %s1443_s27  ;;  %p1449_p8 = scmp.lt.u32.totalorder %s1443_s27, %s1962_s15 }
 0x25c   : > { %p1448_p7 = por %p1447_p6, %p1446_p5 }
 0x25e   : > { %p1450_p9 = por %p1449_p8, %p1448_p7 }
 0x260   : > { %p1451_p10 = pnand %p1450_p9, %p1444_p4 }
 0x262   : > { %1454 = shalt.err (!%p1451_p10)  }
 0x263   : > { %s1550_s13 = smov 128   ;;  %s1551_s28 = smov 256  }
 0x264   : > { %s1552_s22 = smov 8   ;;  %s2065_s20 = sshll.u32 %s1640_s30, 7 }
 0x265   : > { %927 = dma.vmem_to_hbm [thread:$0]  %s1957_s10, 2048, %s1962_s15, %s1667_s11, %s1550_s13, %s1551_s28, %s1552_s22 }
 0x266   : > { %s931_s29 = sshra.s32 %s2065_s20, 3  ;;  %s928_s23 = scalar_lea.vmem [#allocation3], %s1866_s26 }
 0x267   : > { %s1145_s27 = sshll.u32 %s931_s29, 1  ;;  %s940_s0 = sshll.u32 %s928_s23, 4  ;;  %s941_s0 = int_to_ptr.vmem [resolvable:$true] %s940_s0 }
 0x268   : > { %s934_s8 = sadd.s32 %s1145_s27, %s1964_s21  ;;  %p1313_p11 = scmp.eq.s32.totalorder %s1527_s14, 1 }
 0x269   : > { %s1146_s12 = sshll.u32 %s934_s8, 7  ;;  %s1455_s4 = scalar_lea.vmem %s941_s0, 2048 }
 0x26a   : > { %s936_s3 = scalar_lea.hbm %s2049_s7, %s1146_s12  ;;  %p1456_p12 = scmp.ne.s32.totalorder %s941_s0, %s1455_s4 }
 0x26b   : > { %s1553_s5 = smov [#allocation3]  }
 0x26c   : > { %s1457_s6 = sshll.u32 %s1553_s5, 4  ;;  %s1458_s6 = int_to_ptr.vmem [resolvable:$false] %s1457_s6 }
 0x26d   : > { %s1459_s19 = scalar_lea.vmem %s1458_s6, 4096  ;;  %p1460_p13 = scmp.lt.s32.totalorder %s941_s0, %s1458_s6 }
 0x26e   : > { %p1461_p0 = scmp.lt.s32.totalorder %s1459_s19, %s1455_s4 }
 0x270   : > { %p1462_p1 = por %p1461_p0, %p1460_p13 }
 0x272   : > { %p1463_p2 = pnand %p1462_p1, %p1456_p12 }
 0x274   : > { %1466 = shalt.err (!%p1463_p2)  }
 0x275   : > { %s1467_s30 = scalar_lea.hbm %s936_s3, 2048  ;;  %p1470_p4 = scmp.lt.u32.totalorder %s936_s3, %s2049_s7 }
 0x276   : > { %p1468_p3 = scmp.ne.s32.totalorder %s936_s3, %s1467_s30  ;;  %s2066_s9 = scalar_lea.hbm %s2049_s7, 8192 }
 0x277   : > { %p1471_p5 = scmp.lt.u32.totalorder %s2066_s9, %s1467_s30  ;;  %p1473_p7 = scmp.lt.u32.totalorder %s1467_s30, %s936_s3 }
 0x279   : > { %p1472_p6 = por %p1471_p5, %p1470_p4 }
 0x27b   : > { %p1474_p8 = por %p1473_p7, %p1472_p6 }
 0x27d   : > { %p1475_p9 = pnand %p1474_p8, %p1468_p3 }
 0x27f   : > { %1478 = shalt.err (!%p1475_p9)  }
 0x280   : > { %943 = dma.vmem_to_hbm [thread:$0]  %s941_s0, 2048, %s936_s3, %s1672_s1, %s1550_s13, %s1551_s28, %s1552_s22 }
 0x281   : > { %1510 = dma.done.wait (%p1313_p11), %s1667_s11, 2048 }
 0x282   : > { %1512 = vsyncadd (%p1313_p11), %s1667_s11, 4294965248 }
 0x283   : > { %1514 = dma.done.wait (%p1313_p11), %s1672_s1, 2048 }
 0x284   : > { %1516 = vsyncadd (%p1313_p11), %s1672_s1, 4294965248  ;;  %s954_s4 = ssub.s32 1, %s2089_s24 }
 0x285   : > { %s955_s5 = scalar_lea.sflag [#allocation4], %s954_s4 }
 0x286   : > { %1518 = dma.done.wait (%p1313_p11), %s955_s5, 2048 }
 0x287   : > { %1520 = vsyncadd (%p1313_p11), %s955_s5, 4294965248  ;;  %s1034_s3 = scalar_lea.sflag %s955_s5, 2 [#allocation4] }
 0x288   : > { %1522 = dma.done.wait (%p1313_p11), %s1034_s3, 2048 }
 0x289   : > { %1524 = vsyncadd (%p1313_p11), %s1034_s3, 4294965248 }
 0x28a PF: > { %s31_s17 = sadd.s32 1, %s1543_s17   ;;  %s2067_s6 = sld [smem:[#allocation18_spill]] }
 0x28b   : > { %p28_p10 = scmp.ge.s32.totalorder %s31_s17, 5   ;;  %s2068_s14 = smov %s1535_s16 }
 0x28c   : > { %s2069_s15 = smov %s1539_s2  ;;  %s2070_s16 = smov %s2073_s18 }
 0x28d   :  { %30 = sbr.rel (!%p28_p10) target bundleno = 40 (0x28), region = 90 }
 0x290   : > { %s2071_s2 = smov %s2067_s6 }
 0x294   :  { %962 = vsyncmov [#allocation4] }
 0x297   :  { %s963_s19 = vpop.sfrf %962 }
 0x298   :  { %p1148_p11 = scmp.ne.s32.totalorder %s963_s19, 0 }
 0x29a   :  { %967 = shalt.err (%p1148_p11)  }
 0x29b   :  { %969 = vsyncmov [#allocation4 + $0x1] }
 0x29e   :  { %s970_s24 = vpop.sfrf %969 }
 0x29f   :  { %p1149_p12 = scmp.ne.s32.totalorder %s970_s24, 0 }
 0x2a1   :  { %974 = shalt.err (%p1149_p12)  }
 0x2a2   :  { %976 = vsyncmov [#allocation4 + $0x2] }
 0x2a5   :  { %s977_s11 = vpop.sfrf %976 }
 0x2a6   :  { %p1150_p13 = scmp.ne.s32.totalorder %s977_s11, 0 }
 0x2a8   :  { %981 = shalt.err (%p1150_p13)  }
 0x2a9   :  { %983 = vsyncmov [#allocation4 + $0x3] }
 0x2ac   :  { %s984_s1 = vpop.sfrf %983 }
 0x2ad   :  { %p1151_p0 = scmp.ne.s32.totalorder %s984_s1, 0 }
 0x2af   :  { %988 = shalt.err (%p1151_p0)  }

</bundles_post_ra>
